<compile_context>
chip_gen: v6e
topology: v6e:2x2x1
jax: 0.10.0
libtpu: 0.0.40
codegen_flags: <defaults>
</compile_context>

<pallas_src>
import math

import jax
import jax.numpy as jnp
from jax.experimental import pallas as pl
from jax.experimental.pallas import tpu as pltpu

HIDDEN = 128   # feature width of the module
N_SLAB = 128   # padded fused-head width: [W_q | zeros]


def _round_up(n: int, m: int) -> int:
    return ((n + m - 1) // m) * m


# ---------------------------------------------------------------------------
# Pallas kernel: whole forward hot path for one batch tile
# ---------------------------------------------------------------------------
def dueling_kernel(x_ref, w1_ref, b1_ref, w2_ref, b2_ref, q_ref):
    # x_ref:  (bt, in_dim)   f32   raw input tile (cast to bf16 in-kernel)
    # w1_ref: (in_dim, 128)  bf16  feature weights
    # b1_ref: (1, 128)       f32
    # w2_ref: (128, 128)     bf16  fused dueling slab [W_q | zeros]
    # b2_ref: (1, 128)       f32   fused bias row     [b_q | zeros]
    # q_ref:  (bt, 128)      bf16  (columns >= out_dim are junk; wrapper slices)
    x = x_ref[...].astype(jnp.bfloat16)
    feat = jnp.dot(x, w1_ref[...], preferred_element_type=jnp.float32)
    feat = jnp.maximum(feat + b1_ref[...], 0.0)                       # (bt, 128) f32
    q = jnp.dot(feat.astype(jnp.bfloat16), w2_ref[...],
                preferred_element_type=jnp.float32)
    q_ref[...] = (q + b2_ref[...]).astype(q_ref.dtype)                # lane-dense bf16 store


# ---------------------------------------------------------------------------
# One-time weight preparation (dueling combine folded into the head slab)
# ---------------------------------------------------------------------------
def _prepare_weights(w_feat, b_feat, w_adv, b_adv, w_val, b_val):
    in_dim = w_feat.shape[0]
    out_dim = w_adv.shape[1]
    assert out_dim <= N_SLAB, "out_dim too large for the 128-wide fused head slab"

    w1_bf = w_feat.astype(jnp.bfloat16)                               # (in_dim, 128)
    b1 = b_feat.reshape(1, HIDDEN).astype(jnp.float32)

    # q_j = feat @ (W_adv[:,j] + w_val - mean(W_adv)) + (b_adv[j] + b_val - mean(b_adv))
    #     = adv_j + value - mean(adv)   (exact in f32; bf16-quantized once here)
    w_q = w_adv + w_val.reshape(HIDDEN, 1) - jnp.mean(w_adv, axis=1, keepdims=True)
    b_q = b_adv + b_val.reshape(()) - jnp.mean(b_adv)

    w2 = jnp.zeros((HIDDEN, N_SLAB), jnp.float32).at[:, :out_dim].set(w_q)
    b2 = jnp.zeros((1, N_SLAB), jnp.float32).at[0, :out_dim].set(b_q)
    return w1_bf, b1, w2.astype(jnp.bfloat16), b2, in_dim, out_dim


def _batch_tiling(B: int, block_b: int):
    """Pick (bt, steps): bt multiple of 16 (bf16 output sublane rule), tiny
    padding waste, and >=2 grid steps for medium/large batches (v7x 2nd TC)."""
    nsteps = int(pl.cdiv(B, block_b))
    if B >= 256:
        nsteps = max(nsteps, 2)
    bt = _round_up(int(pl.cdiv(B, nsteps)), 16)
    if bt >= B:
        # Single block spanning the whole batch: full-dim block, always legal.
        return B, 1
    return bt, int(pl.cdiv(B, bt))


def dueling_forward(x, w_feat, b_feat, w_adv, b_adv, w_val, b_val, *, block_b=1024):
    """x: (B, in_dim) f32.  Returns q: (B, out_dim) f32."""
    B, in_dim = x.shape
    w1_bf, b1, w2_bf, b2, _, out_dim = _prepare_weights(
        w_feat, b_feat, w_adv, b_adv, w_val, b_val)
    bt, steps = _batch_tiling(B, block_b)

    flops = 2 * B * HIDDEN * (in_dim + N_SLAB)
    bytes_accessed = int(x.size * 4 + w1_bf.size * 2 + w2_bf.size * 2
                         + b1.size * 4 + b2.size * 4 + B * N_SLAB * 2)

    q_slab = pl.pallas_call(
        dueling_kernel,
        out_shape=jax.ShapeDtypeStruct((B, N_SLAB), jnp.bfloat16),
        grid_spec=pltpu.PrefetchScalarGridSpec(
            num_scalar_prefetch=0,
            grid=(steps,),
            in_specs=[
                # batch-tiled raw activations (no pre-pad / pre-cast)
                pl.BlockSpec((bt, in_dim), lambda i: (i, 0)),
                # weights / biases: same block every step -> VMEM-resident
                pl.BlockSpec((in_dim, HIDDEN), lambda i: (0, 0)),
                pl.BlockSpec((1, HIDDEN), lambda i: (0, 0)),
                pl.BlockSpec((HIDDEN, N_SLAB), lambda i: (0, 0)),
                pl.BlockSpec((1, N_SLAB), lambda i: (0, 0)),
            ],
            out_specs=pl.BlockSpec((bt, N_SLAB), lambda i: (i, 0)),
        ),
        compiler_params=pltpu.CompilerParams(
            dimension_semantics=("parallel",)),   # both TCs on v7x; harmless on v5e/v6e
        cost_estimate=pl.CostEstimate(
            flops=flops, transcendentals=0, bytes_accessed=bytes_accessed),
    )(x, w1_bf, b1, w2_bf, b2)

    # Tiny slice + cast back to the module's f32 interface.
    return q_slab[:, :out_dim].astype(jnp.float32)


# ---------------------------------------------------------------------------
# Deterministic parameter construction (mirrors the PyTorch __init__)
# ---------------------------------------------------------------------------
def _scale_noise(key, size):
    """Factorized gaussian noise: sign(x) * sqrt(|x|)."""
    x = jax.random.normal(key, (size,), dtype=jnp.float32)
    return jnp.sign(x) * jnp.sqrt(jnp.abs(x))


def make_noisy_linear_params(key, in_features, out_features, std_init=0.5):
    """Return effective (W, b) with W of shape (in_features, out_features)."""
    k_mu_w, k_mu_b, k_eps_in, k_eps_out = jax.random.split(key, 4)
    mu_range = 1.0 / math.sqrt(in_features)
    weight_mu = jax.random.uniform(k_mu_w, (out_features, in_features),
                                   minval=-mu_range, maxval=mu_range,
                                   dtype=jnp.float32)
    bias_mu = jax.random.uniform(k_mu_b, (out_features,),
                                 minval=-mu_range, maxval=mu_range,
                                 dtype=jnp.float32)
    weight_sigma = jnp.full((out_features, in_features),
                            std_init / math.sqrt(in_features), jnp.float32)
    bias_sigma = jnp.full((out_features,),
                          std_init / math.sqrt(out_features), jnp.float32)
    eps_in = _scale_noise(k_eps_in, in_features)
    eps_out = _scale_noise(k_eps_out, out_features)
    weight_eps = jnp.outer(eps_out, eps_in)      # (out, in)
    bias_eps = eps_out

    w_eff = weight_mu + weight_sigma * weight_eps     # (out, in)
    b_eff = bias_mu + bias_sigma * bias_eps           # (out,)
    return w_eff.T, b_eff                             # stored as (in, out)


def make_linear_params(key, in_features, out_features):
    """PyTorch nn.Linear default init, returned as ((in, out), (out,))."""
    k_w, k_b = jax.random.split(key)
    bound = 1.0 / math.sqrt(in_features)
    w = jax.random.uniform(k_w, (out_features, in_features),
                           minval=-bound, maxval=bound, dtype=jnp.float32)
    b = jax.random.uniform(k_b, (out_features,),
                           minval=-bound, maxval=bound, dtype=jnp.float32)
    return w.T, b


# ---------------------------------------------------------------------------
# References for correctness
# ---------------------------------------------------------------------------
def reference_forward(x, w_feat, b_feat, w_adv, b_adv, w_val, b_val):
    """Exact f32 module semantics."""
    feat = jax.nn.relu(x @ w_feat + b_feat)
    val = feat @ w_val + b_val                      # (B, 1)
    adv = feat @ w_adv + b_adv                      # (B, out_dim)
    return val + adv - adv.mean(axis=-1, keepdims=True)


def slab_reference(x, w1_bf, b1, w2_bf, b2, out_dim):
    """Same fused/quantized math as the kernel, in plain jnp (tight check)."""
    feat = jnp.maximum(
        x.astype(jnp.bfloat16).astype(jnp.float32) @ w1_bf.astype(jnp.float32) + b1, 0.0)
    q = feat.astype(jnp.bfloat16).astype(jnp.float32) @ w2_bf.astype(jnp.float32) + b2
    return q.astype(jnp.bfloat16)[:, :out_dim].astype(jnp.float32)


def _run_case(key, B, in_dim, out_dim):
    k_x, k_feat, k_adv_h, k_adv, k_val_h, k_val = jax.random.split(key, 6)
    x = jax.random.normal(k_x, (B, in_dim), dtype=jnp.float32)

    # feature_layer: nn.Linear(in_dim, 128)
    w_feat, b_feat = make_linear_params(k_feat, in_dim, HIDDEN)
    # hidden noisy layers exist in __init__ but are unused in forward();
    # instantiate for fidelity only.
    _ = make_noisy_linear_params(k_adv_h, HIDDEN, HIDDEN)
    _ = make_noisy_linear_params(k_val_h, HIDDEN, HIDDEN)
    # advantage_layer: NoisyLinear(128, out_dim); value_layer: NoisyLinear(128, 1)
    w_adv, b_adv = make_noisy_linear_params(k_adv, HIDDEN, out_dim)
    w_val, b_val = make_noisy_linear_params(k_val, HIDDEN, 1)

    q = dueling_forward(x, w_feat, b_feat, w_adv, b_adv, w_val, b_val)
    jax.block_until_ready(q)
    assert q.shape == (B, out_dim)

    # Tight check: kernel vs identical fused/quantized math in plain jnp.
    w1_bf, b1, w2_bf, b2, _, od = _prepare_weights(
        w_feat, b_feat, w_adv, b_adv, w_val, b_val)
    q_slab = slab_reference(x, w1_bf, b1, w2_bf, b2, od)
    assert jnp.allclose(q, q_slab, atol=1e-2, rtol=1e-2), \
        f"mismatch vs fused-slab reference (B={B})"

    # Loose check: kernel (bf16 matmuls + bf16 store) vs exact f32 semantics.
    q_ref = reference_forward(x, w_feat, b_feat, w_adv, b_adv, w_val, b_val)
    assert jnp.allclose(q, q_ref, atol=4e-2, rtol=4e-2), \
        f"mismatch vs f32 module reference (B={B})"


if __name__ == "__main__":
    key = jax.random.PRNGKey(0)
    k1, k2 = jax.random.split(key)
    # Small shape (single full-batch block) and a medium shape that exercises
    # the multi-step / dual-TensorCore batch grid.
    _run_case(k1, B=8, in_dim=32, out_dim=8)
    _run_case(k2, B=256, in_dim=32, out_dim=6)
    print("KERNEL_OK")
</pallas_src>

<mosaic_0001>
module attributes {stable_mosaic.version = 11 : i64} {
  func.func @dueling_kernel(%arg0: i32, %arg1: memref<8x32xf32, #tpu.memory_space<vmem>>, %arg2: memref<32x128xbf16, #tpu.memory_space<vmem>>, %arg3: memref<1x128xf32, #tpu.memory_space<vmem>>, %arg4: memref<128x128xbf16, #tpu.memory_space<vmem>>, %arg5: memref<1x128xf32, #tpu.memory_space<vmem>>, %arg6: memref<8x128xbf16, #tpu.memory_space<vmem>>) attributes {dimension_semantics = [#tpu.dimension_semantics<parallel>], iteration_bounds = array<i64: 1>, scalar_prefetch = 0 : i64, scratch_operands = 0 : i64, tpu.core_type = #tpu.core_type<tc>, window_params = [{transform_indices = @transform_0, window_bounds = array<i64: 8, 32>}, {pipeline_mode = #tpu.pipeline_mode<synchronous>, transform_indices = @transform_1, window_bounds = array<i64: 32, 128>}, {pipeline_mode = #tpu.pipeline_mode<synchronous>, transform_indices = @transform_2, window_bounds = array<i64: 1, 128>}, {pipeline_mode = #tpu.pipeline_mode<synchronous>, transform_indices = @transform_3, window_bounds = array<i64: 128, 128>}, {pipeline_mode = #tpu.pipeline_mode<synchronous>, transform_indices = @transform_4, window_bounds = array<i64: 1, 128>}, {transform_indices = @transform_5, window_bounds = array<i64: 8, 128>}]} {
    %c0 = arith.constant 0 : index
    %c0_0 = arith.constant 0 : index
    %0 = vector.load %arg1[%c0, %c0_0] : memref<8x32xf32, #tpu.memory_space<vmem>>, vector<8x32xf32>
    %1 = arith.truncf %0 : vector<8x32xf32> to vector<8x32xbf16>
    %c0_1 = arith.constant 0 : index
    %c0_2 = arith.constant 0 : index
    %2 = vector.load %arg2[%c0_1, %c0_2] : memref<32x128xbf16, #tpu.memory_space<vmem>>, vector<32x128xbf16>
    %cst = arith.constant dense<0.000000e+00> : vector<8x128xf32>
    %3 = tpu.matmul %1, %2, %cst {dimension_numbers = #tpu.dot_dimension_numbers<[1], [0], [0], [1], [0, 0, 1, 1], [], []>} : vector<8x32xbf16>, vector<32x128xbf16>, vector<8x128xf32> -> vector<8x128xf32>
    %c0_3 = arith.constant 0 : index
    %c0_4 = arith.constant 0 : index
    %4 = vector.load %arg3[%c0_3, %c0_4] : memref<1x128xf32, #tpu.memory_space<vmem>>, vector<1x128xf32>
    %5 = vector.broadcast %4 : vector<1x128xf32> to vector<8x128xf32>
    %6 = arith.addf %3, %5 : vector<8x128xf32>
    %cst_5 = arith.constant 0.000000e+00 : f32
    %7 = vector.broadcast %cst_5 : f32 to vector<8x128xf32>
    %8 = arith.maximumf %6, %7 : vector<8x128xf32>
    %9 = arith.truncf %8 : vector<8x128xf32> to vector<8x128xbf16>
    %c0_6 = arith.constant 0 : index
    %c0_7 = arith.constant 0 : index
    %10 = vector.load %arg4[%c0_6, %c0_7] : memref<128x128xbf16, #tpu.memory_space<vmem>>, vector<128x128xbf16>
    %cst_8 = arith.constant dense<0.000000e+00> : vector<8x128xf32>
    %11 = tpu.matmul %9, %10, %cst_8 {dimension_numbers = #tpu.dot_dimension_numbers<[1], [0], [0], [1], [0, 0, 1, 1], [], []>} : vector<8x128xbf16>, vector<128x128xbf16>, vector<8x128xf32> -> vector<8x128xf32>
    %c0_9 = arith.constant 0 : index
    %c0_10 = arith.constant 0 : index
    %12 = vector.load %arg5[%c0_9, %c0_10] : memref<1x128xf32, #tpu.memory_space<vmem>>, vector<1x128xf32>
    %13 = vector.broadcast %12 : vector<1x128xf32> to vector<8x128xf32>
    %14 = arith.addf %11, %13 : vector<8x128xf32>
    %15 = arith.truncf %14 : vector<8x128xf32> to vector<8x128xbf16>
    %c0_11 = arith.constant 0 : index
    %c0_12 = arith.constant 0 : index
    %16 = vector.load %arg6[%c0_11, %c0_12] : memref<8x128xbf16, #tpu.memory_space<vmem>>, vector<8x128xbf16>
    tpu.vector_store %arg6[%c0_11, %c0_12], %15 {strides = array<i32>} : memref<8x128xbf16, #tpu.memory_space<vmem>>, vector<8x128xbf16>,
    return
  }
  func.func @transform_0(%arg0: i32) -> (i32, i32) {
    %c0_i32 = arith.constant 0 : i32
    %c0_i32_0 = arith.constant 0 : i32
    return %arg0, %c0_i32 : i32, i32
  }
  func.func @transform_1(%arg0: i32) -> (i32, i32) {
    %c0_i32 = arith.constant 0 : i32
    %c0_i32_0 = arith.constant 0 : i32
    %c0_i32_1 = arith.constant 0 : i32
    return %c0_i32, %c0_i32_0 : i32, i32
  }
  func.func @transform_2(%arg0: i32) -> (i32, i32) {
    %c0_i32 = arith.constant 0 : i32
    %c0_i32_0 = arith.constant 0 : i32
    %c0_i32_1 = arith.constant 0 : i32
    return %c0_i32, %c0_i32_0 : i32, i32
  }
  func.func @transform_3(%arg0: i32) -> (i32, i32) {
    %c0_i32 = arith.constant 0 : i32
    %c0_i32_0 = arith.constant 0 : i32
    %c0_i32_1 = arith.constant 0 : i32
    return %c0_i32, %c0_i32_0 : i32, i32
  }
  func.func @transform_4(%arg0: i32) -> (i32, i32) {
    %c0_i32 = arith.constant 0 : i32
    %c0_i32_0 = arith.constant 0 : i32
    %c0_i32_1 = arith.constant 0 : i32
    return %c0_i32, %c0_i32_0 : i32, i32
  }
  func.func @transform_5(%arg0: i32) -> (i32, i32) {
    %c0_i32 = arith.constant 0 : i32
    %c0_i32_0 = arith.constant 0 : i32
    return %arg0, %c0_i32 : i32, i32
  }
}

</mosaic_0001>

<bundles_post_ra>
// kernel: tpu_custom_call.1
= control target key start
LH: loop header
LB: loop body
LE: loop exit
PB: predicated region body
PF: predicated region fallthrough
CT: control target
= control target key end

     0   :  { %10 = vsyncpa [#allocation3], 0  ;;  %s474_s0 = inlined_call_operand.hbm [shape: f32[8,32], index: 0, kind: input, shape index: {}]   ;;  %s475_s1 = inlined_call_operand.hbm [shape: bf16[32,128], index: 1, kind: input, shape index: {}]   ;;  %s476_s2 = inlined_call_operand.vmem [shape: f32[1,128], index: 2, kind: input, shape index: {}]   ;;  %s477_s3 = inlined_call_operand.hbm [shape: bf16[128,128], index: 3, kind: input, shape index: {}]   ;;  %s478_s4 = inlined_call_operand.vmem [shape: f32[1,128], index: 4, kind: input, shape index: {}]   ;;  %s479_s5 = inlined_call_operand.hbm [shape: bf16[8,128], index: 5, kind: output, shape index: {}]  }
   0x1   :  { %11 = vsyncpa [#allocation6], 0 }
   0x2   :  { %12 = vsyncpa [#allocation4], 0  ;;  %s418_s18 = smov [#allocation5]  }
   0x3   :  { %s28_s19 = sshll.u32 %s418_s18, 4  ;;  %s29_s19 = int_to_ptr.vmem [resolvable:$true] %s28_s19 }
   0x4   :  { %s340_s20 = scalar_lea.vmem %s29_s19, 256  ;;  %p345_p1 = scmp.lt.s32.totalorder %s29_s19, %s29_s19 }
   0x5   :  { %p341_p0 = scmp.ne.s32.totalorder %s29_s19, %s340_s20  ;;  %p346_p2 = scmp.lt.s32.totalorder %s340_s20, %s340_s20 }
   0x7   :  { %p347_p3 = por %p346_p2, %p345_p1 }
   0x9   :  { %p348_p4 = pnand %p347_p3, %p341_p0 }
   0xb   :  { %351 = shalt.err (!%p348_p4)
}
   0xc   :  { %s419_s21 = smov 64   ;;  %s420_s22 = smov 4  }
   0xd   :  { %34 = dma.hbm_to_vmem [thread:$0]  %s475_s1, 256, %s29_s19, [#allocation6], %s419_s21, %s419_s21, %s420_s22  }
   0xe   :  { %s421_s25 = smov [#allocation2]   ;;  %s422_s27 = smov [#allocation7]  }
   0xf   :  { %s19_s26 = sshll.u32 %s421_s25, 4  ;;  %s42_s28 = sshll.u32 %s422_s27, 4  ;;  %s20_s26 = int_to_ptr.vmem [resolvable:$true] %s19_s26  ;;  %s43_s28 = int_to_ptr.vmem [resolvable:$true] %s42_s28 }
  0x10   :  { %s360_s29 = scalar_lea.vmem %s20_s26, 128  ;;  %p365_p6 = scmp.lt.s32.totalorder %s20_s26, %s20_s26 }
  0x11   :  { %p361_p5 = scmp.ne.s32.totalorder %s20_s26, %s360_s29  ;;  %p366_p7 = scmp.lt.s32.totalorder %s360_s29, %s360_s29 }
  0x13   :  { %p367_p8 = por %p366_p7, %p365_p6 }
  0x15   :  { %p368_p9 = pnand %p367_p8, %p361_p5 }
  0x17   :  { %371 = shalt.err (!%p368_p9)
}
  0x18   :  { %22 = dma.hbm_to_vmem [thread:$0]  %s474_s0, 128, %s20_s26, [#allocation3]  }
  0x19   :  { %s380_s7 = scalar_lea.vmem %s43_s28, 1024  ;;  %p385_p11 = scmp.lt.s32.totalorder %s43_s28, %s43_s28 }
  0x1a   :  { %p381_p10 = scmp.ne.s32.totalorder %s43_s28, %s380_s7  ;;  %p386_p12 = scmp.lt.s32.totalorder %s380_s7, %s380_s7 }
  0x1c   :  { %p387_p13 = por %p386_p12, %p385_p11 }
  0x1e   :  { %p388_p0 = pnand %p387_p13, %p381_p10 }
  0x20   :  { %391 = shalt.err (!%p388_p0)
}
  0x21   :  { %48 = dma.hbm_to_vmem [thread:$0]  %s477_s3, 1024, %s43_s28, [#allocation6], %s419_s21, %s419_s21, %s420_s22  }
  0x22   :  { %412 = dma.done.wait [#allocation3], 128  }
  0x23   :  { %413 = vsyncadd [#allocation3], 4294967168 }
  0x24   :  { %414 = dma.done.wait [#allocation6], 1280  }
  0x25   :  { %415 = vsyncadd [#allocation6], 4294966016  ;;  %v423_v0 = vmov 0.0   ;;  %vm424_vm0 = vmmov 0   ;;  %v322_v1 = vld [vmem:[#allocation5 + $0x8] sm:$0xff]   ;;  %v323_v2 = vld [vmem:[#allocation5] sm:$0xff]  }
  0x26   :  { %286 = vmatprep.subr.bf16.mxu0 %v423_v0  ;;  %290 = vmatprep.mubr.msk.bf16.mxu0 %vm424_vm0, %v423_v0  ;;  %v61_v3 = vld [vmem:[#allocation2] sm:$0xff]  ;;  %v324_v4 = vld [vmem:[#allocation7 + $0x38] sm:$0xff]   ;;  %v325_v6 = vld [vmem:[#allocation7 + $0x30] sm:$0xff]   ;;  %vm86_vm1 = vcmask 261120   ;;  %s425_s11 = smov [#allocation8]  }
  0x27   :  { %294 = vmatprep.subr.bf16.mxu1 %v423_v0  ;;  %310 = vmatprep.mubr.msk.bf16.mxu1 %vm424_vm0, %v423_v0  ;;  %v62_v5 = vpack.c.bf16 %v61_v3, %v61_v3  ;;  %v326_v7 = vld [vmem:[#allocation7 + $0x28] sm:$0xff]   ;;  %v327_v8 = vld [vmem:[#allocation7 + $0x20] sm:$0xff]   ;;  %v328_v9 = vld [vmem:[#allocation7 + $0x18] sm:$0xff]   ;;  %s251_s12 = sshll.u32 %s425_s11, 4  ;;  %s252_s12 = int_to_ptr.vmem [resolvable:$true] %s251_s12 }
  0x28   :  { %287 = vmatpush3.bf16.msra.mxu0 %v322_v1  ;;  %295 = vmatpush3.bf16.msra.mxu1 %v324_v4  ;;  %v329_v10 = vld [vmem:[#allocation7 + $0x10] sm:$0xff]   ;;  %v330_v11 = vld [vmem:[#allocation7 + $0x8] sm:$0xff]   ;;  %v331_v12 = vld [vmem:[#allocation7] sm:$0xff]   ;;  %p397_p2 = scmp.lt.s32.totalorder %s252_s12, %s252_s12 }
  0x29   :  { %288 = vmatprep.subr.bf16.mxu0 %v423_v0  ;;  %296 = vmatprep.subr.bf16.mxu1 %v423_v0  ;;  %v261_v13 = vld [vmem:[%s476_s2] ss:$0 sm:$0xff]  ;;  %s392_s2 = scalar_lea.vmem %s252_s12, 64 }
  0x2a   :  { %v265_v21 = vld [vmem:[%s478_s4] ss:$0 sm:$0xff]  ;;  %p393_p1 = scmp.ne.s32.totalorder %s252_s12, %s392_s2  ;;  %p398_p3 = scmp.lt.s32.totalorder %s392_s2, %s392_s2 }
  0x2c   :  { %289 = vmatpush3.bf16.msra.mxu0 %v323_v2  ;;  %297 = vmatpush3.bf16.msra.mxu1 %v325_v6  ;;  %p399_p4 = por %p398_p3, %p397_p2 }
  0x2d   :  { %298 = vmatprep.subr.bf16.mxu1 %v423_v0 }
  0x2e   :  { %p400_p5 = pnand %p399_p4, %p393_p1 }
  0x2f   :  { %291 = vmatmul.mubr.msk.bf16.vlgmr.msra.gmra.mxu0 %vm86_vm1, %v62_v5 }
  0x30   :  { %299 = vmatpush3.bf16.msra.mxu1 %v326_v7 }
  0x31   :  { %300 = vmatprep.subr.bf16.mxu1 %v423_v0 }
  0x34   :  { %301 = vmatpush3.bf16.msra.mxu1 %v327_v8 }
  0x35   :  { %302 = vmatprep.subr.bf16.mxu1 %v423_v0 }
  0x38   :  { %303 = vmatpush3.bf16.msra.mxu1 %v328_v9 }
  0x39   :  { %304 = vmatprep.subr.bf16.mxu1 %v423_v0 }
  0x3c   :  { %305 = vmatpush3.bf16.msra.mxu1 %v329_v10 }
  0x3d   :  { %306 = vmatprep.subr.bf16.mxu1 %v423_v0 }
  0x40   :  { %307 = vmatpush3.bf16.msra.mxu1 %v330_v11 }
  0x41   :  { %308 = vmatprep.subr.bf16.mxu1 %v423_v0 }
  0x44   :  { %309 = vmatpush3.bf16.msra.mxu1 %v331_v12 }
  0xef   :  { %v124_v14 = vpop.f32.mrf.mxu0 }
  0xf0   :  { %v125_v15 = vadd.f32 %v261_v13, %v124_v14 }
  0xf1   :  { %v292_v16 = vpop.f32.mrf.mxu0 }
  0xf2   :  { %v130_v17 = vmax.f32 %v125_v15, 0.0 }
  0xf3   :  { %v127_v18 = vpop.f32.mrf.mxu0 }
  0xf4   :  { %v131_v19 = vpack.c.bf16 %v130_v17, %v130_v17 }
  0xf5   :  { %v293_v20 = vpop.f32.mrf.mxu0 }
  0xf6   :  { %311 = vmatmul.mubr.bf16.vlgmr.msra.gmra.mxu1 %v131_v19 }
 0x1b6   :  { %v237_v22 = vpop.f32.mrf.mxu1 }
 0x1b7   :  { %v238_v23 = vadd.f32 %v265_v21, %v237_v22 }
 0x1b8   :  { %v312_v24 = vpop.f32.mrf.mxu1 }
 0x1b9   :  { %v243_v25 = vpack.c.bf16 %v238_v23, %v238_v23 }
 0x1ba   :  { %v240_v26 = vpop.f32.mrf.mxu1 }
 0x1bb   :  { %244 = vst [vmem:[#allocation8] sm:$0xf] %v243_v25 }
 0x1bc   :  { %v313_v27 = vpop.f32.mrf.mxu1 }
 0x1bd   :  { %403 = shalt.err (!%p400_p5)
}
 0x1be   :  { %254 = dma.vmem_to_hbm [thread:$0]  %s252_s12, 64, %s479_s5, [#allocation4]  }
 0x1bf   :  { %416 = dma.done.wait [#allocation4], 64  }
 0x1c0   :  { %417 = vsyncadd [#allocation4], 4294967232 }
 0x1c1   :  { %258 = vsyncpa [#allocation3], 1 }
 0x1c2   :  { %259 = vsyncpa [#allocation6], 1 }
 0x1c3   :  { %260 = vsyncpa [#allocation4], 1 }

</bundles_post_ra>
